<compile_context>
chip_gen: v7x
topology: tpu7x:2x2x1
jax: 0.10.0
libtpu: 0.0.40
codegen_flags: <defaults>
</compile_context>

<pallas_src>
import functools

import jax
import jax.numpy as jnp
from jax import lax
from jax.experimental import pallas as pl
from jax.experimental.pallas import tpu as pltpu

PRE_RANK = 8
PRE_LAMBDA = 0.03


def _pretrain_kernel(u_idx_ref, i_idx_ref, r_ref, uf_ref, if_ref,
                     loss_ref, rmse_ref, *, batch, tile_b):
    """Fused MF pretraining loss.

    u_idx/i_idx/r : SMEM (B_pad,) int32 / int32 / f32 (whole arrays).
    uf/if         : VMEM (n_user,R) / (n_item,R) f32, fully resident.
    loss/rmse     : VMEM (1,1) f32 outputs; loss doubles as the SSE accumulator
                    across the batch-tile grid axis.

    Indices are assumed in range (torch F.embedding semantics); OOB VMEM reads
    are unchecked on TPU.
    """
    t = pl.program_id(0)
    base = t * tile_b

    @pl.when(t == 0)
    def _init():
        loss_ref[...] = jnp.zeros_like(loss_ref)

    def row_body(j, acc):
        row = base + j
        # Exact gather: one dynamic-sublane slice per table row (no MXU).
        u_row = uf_ref[pl.ds(u_idx_ref[row], 1), :]              # (1, R)
        i_row = if_ref[pl.ds(i_idx_ref[row], 1), :]              # (1, R)
        r_hat = jnp.sum(u_row * i_row, axis=1, keepdims=True)    # (1, 1)
        d = r_hat - r_ref[row]                                   # (1, 1)
        valid = jnp.where(row < batch, 1.0, 0.0)                 # mask batch pad
        return acc + valid * (d * d)

    # TODO(synk): at production sizes replace this row loop with a vectorized
    # dynamic-gather (lane-dense (R, B) layout) or a per-row DMA gather from
    # pl.ANY tables, and tile the tables instead of keeping them VMEM-resident
    # (required once (n_user+n_item)*R*4 approaches v7x's 64 MiB VMEM).
    tile_sse = lax.fori_loop(0, tile_b, row_body,
                             jnp.zeros((1, 1), jnp.float32))
    loss_ref[...] += tile_sse

    @pl.when(t == pl.num_programs(0) - 1)
    def _finalize():
        sse = loss_ref[...]                                      # (1, 1)
        uf = uf_ref[...]
        itf = if_ref[...]
        # Regularizer fused here: the tables are already VMEM-resident.
        reg = (jnp.sum(uf * uf, keepdims=True)
               + jnp.sum(itf * itf, keepdims=True))              # (1, 1)
        loss_ref[...] = sse + PRE_LAMBDA * reg
        rmse_ref[...] = jnp.sqrt(sse * (1.0 / batch))


def pretrain_forward(u, i, r, u_feat, i_feat):
    B = int(u.shape[0])
    n_user, rank = int(u_feat.shape[0]), int(u_feat.shape[1])
    n_item = int(i_feat.shape[0])

    # Batch-tile grid ("arbitrary" reduction axis).
    # TODO(synk): for very large B on v7x, split the batch range across the
    # two TensorCores with per-core partial SSE combined in a finalize step.
    tile_b = min(B, 256)
    nb = -(-B // tile_b)
    b_pad = nb * tile_b

    u_idx = jnp.pad(u.astype(jnp.int32), (0, b_pad - B))
    i_idx = jnp.pad(i.astype(jnp.int32), (0, b_pad - B))
    r_vec = jnp.pad(r.astype(jnp.float32), (0, b_pad - B))
    uf = u_feat.astype(jnp.float32)
    itf = i_feat.astype(jnp.float32)

    table_bytes = (n_user + n_item) * rank * 4
    # Derived VMEM budget: double-buffered tables + headroom, capped below
    # v7x's 64 MiB physical VMEM.
    vmem_limit = min(48 * 1024 * 1024,
                     max(8 * 1024 * 1024, 4 * table_bytes + 2 * 1024 * 1024))

    kernel = functools.partial(_pretrain_kernel, batch=B, tile_b=tile_b)

    loss, rmse = pl.pallas_call(
        kernel,
        out_shape=(jax.ShapeDtypeStruct((1, 1), jnp.float32),
                   jax.ShapeDtypeStruct((1, 1), jnp.float32)),
        grid=(nb,),
        in_specs=[
            pl.BlockSpec(memory_space=pltpu.MemorySpace.SMEM),    # user indices
            pl.BlockSpec(memory_space=pltpu.MemorySpace.SMEM),    # item indices
            pl.BlockSpec(memory_space=pltpu.MemorySpace.SMEM),    # ratings
            pl.BlockSpec((n_user, rank), lambda b: (0, 0)),       # user table (VMEM)
            pl.BlockSpec((n_item, rank), lambda b: (0, 0)),       # item table (VMEM)
        ],
        out_specs=(pl.BlockSpec((1, 1), lambda b: (0, 0)),
                   pl.BlockSpec((1, 1), lambda b: (0, 0))),
        compiler_params=pltpu.CompilerParams(
            dimension_semantics=("arbitrary",),
            vmem_limit_bytes=vmem_limit),
        cost_estimate=pl.CostEstimate(
            flops=2 * B * rank + 2 * (n_user + n_item) * rank,
            transcendentals=1,
            bytes_accessed=table_bytes + 3 * b_pad * 4 + 8),
    )(u_idx, i_idx, r_vec, uf, itf)

    return loss[0, 0], rmse[0, 0]


def _create_p_or_q_variable(key, n, rank, mu, std):
    """Deterministic equivalent of torch.nn.init.trunc_normal_(mat, _mu, _std,
    _mu - 2*_std, _mu + 2*_std)."""
    _mu = jnp.sqrt(mu / rank)
    _std = jnp.sqrt((jnp.sqrt(mu * mu + std * std) - mu) / rank)
    z = jax.random.truncated_normal(key, -2.0, 2.0, (n, rank), jnp.float32)
    return _mu + _std * z


def _reference_forward(u, i, r, u_feat, i_feat):
    u_lu = u_feat[u]
    i_lu = i_feat[i]
    r_hat = jnp.sum(u_lu * i_lu, axis=1)
    err2 = jnp.square(r_hat - r)
    sse = jnp.sum(err2)
    rmse = jnp.sqrt(jnp.mean(err2))
    reg = jnp.sum(jnp.square(u_feat)) + jnp.sum(jnp.square(i_feat))
    return sse + PRE_LAMBDA * reg, rmse


if __name__ == "__main__":
    # "batch_manager" configuration (toy sizes)
    n_user, n_item = 32, 48
    mu, std = 3.5, 1.1
    batch = 8

    key = jax.random.PRNGKey(0)
    k_u, k_i, k_uid, k_iid, k_r = jax.random.split(key, 5)

    u_feat = _create_p_or_q_variable(k_u, n_user, PRE_RANK, mu, std)
    i_feat = _create_p_or_q_variable(k_i, n_item, PRE_RANK, mu, std)

    u = jax.random.randint(k_uid, (batch,), 0, n_user, dtype=jnp.int32)
    i = jax.random.randint(k_iid, (batch,), 0, n_item, dtype=jnp.int32)
    r = jax.random.uniform(k_r, (batch,), jnp.float32, 1.0, 5.0)

    loss, rmse = jax.block_until_ready(pretrain_forward(u, i, r, u_feat, i_feat))

    ref_loss, ref_rmse = _reference_forward(u, i, r, u_feat, i_feat)
    assert jnp.allclose(loss, ref_loss, rtol=1e-5, atol=1e-5), (loss, ref_loss)
    assert jnp.allclose(rmse, ref_rmse, rtol=1e-5, atol=1e-5), (rmse, ref_rmse)

    print("KERNEL_OK")
</pallas_src>

<mosaic_0001>
module attributes {stable_mosaic.version = 11 : i64} {
  func.func @_pretrain_kernel(%arg0: i32, %arg1: memref<8xi32, #tpu.memory_space<smem>>, %arg2: memref<8xi32, #tpu.memory_space<smem>>, %arg3: memref<8xf32, #tpu.memory_space<smem>>, %arg4: memref<32x8xf32, #tpu.memory_space<vmem>>, %arg5: memref<48x8xf32, #tpu.memory_space<vmem>>, %arg6: memref<1x1xf32, #tpu.memory_space<vmem>>, %arg7: memref<1x1xf32, #tpu.memory_space<vmem>>) attributes {dimension_semantics = [#tpu.dimension_semantics<arbitrary>], iteration_bounds = array<i64: 1>, scalar_prefetch = 0 : i64, scratch_operands = 0 : i64, tpu.core_type = #tpu.core_type<tc>, window_params = [{transform_indices = @transform_0, window_bounds = array<i64: 8>}, {transform_indices = @transform_1, window_bounds = array<i64: 8>}, {transform_indices = @transform_2, window_bounds = array<i64: 8>}, {pipeline_mode = #tpu.pipeline_mode<synchronous>, transform_indices = @transform_3, window_bounds = array<i64: 32, 8>}, {pipeline_mode = #tpu.pipeline_mode<synchronous>, transform_indices = @transform_4, window_bounds = array<i64: 48, 8>}, {pipeline_mode = #tpu.pipeline_mode<synchronous>, transform_indices = @transform_5, window_bounds = array<i64: 1, 1>}, {pipeline_mode = #tpu.pipeline_mode<synchronous>, transform_indices = @transform_6, window_bounds = array<i64: 1, 1>}]} {
    %c8_i32 = arith.constant 8 : i32
    %0 = arith.muli %arg0, %c8_i32 : i32
    %c0_i32 = arith.constant 0 : i32
    %1 = arith.cmpi eq, %arg0, %c0_i32 : i32
    %2 = arith.extui %1 : i1 to i32
    %c0_i32_0 = arith.constant 0 : i32
    %3 = arith.cmpi ne, %2, %c0_i32_0 : i32
    scf.if %3 {
      %cst_9 = arith.constant 0.000000e+00 : f32
      %13 = vector.broadcast %cst_9 : f32 to vector<1x1xf32>
      %c0_10 = arith.constant 0 : index
      %c0_11 = arith.constant 0 : index
      %14 = vector.load %arg6[%c0_10, %c0_11] : memref<1x1xf32, #tpu.memory_space<vmem>>, vector<1x1xf32>
      tpu.vector_store %arg6[%c0_10, %c0_11], %13 {strides = array<i32>} : memref<1x1xf32, #tpu.memory_space<vmem>>, vector<1x1xf32>,
    } else {
    }
    %cst = arith.constant 0.000000e+00 : f32
    %4 = vector.broadcast %cst : f32 to vector<1x1xf32>
    %c0_i32_1 = arith.constant 0 : i32
    %c8_i32_2 = arith.constant 8 : i32
    %5 = arith.addi %c0_i32_1, %c8_i32_2 : i32
    %c1_i32 = arith.constant 1 : i32
    %6 = scf.for %arg8 = %c0_i32_1 to %5 step %c1_i32 iter_args(%arg9 = %4) -> (vector<1x1xf32>)  : i32 {
      %13 = arith.addi %0, %arg8 : i32
      %14 = arith.index_cast %13 : i32 to index
      %15 = memref.load %arg1[%14] : memref<8xi32, #tpu.memory_space<smem>>
      %16 = arith.index_cast %15 : i32 to index
      %c0_9 = arith.constant 0 : index
      %17 = vector.load %arg4[%16, %c0_9] : memref<32x8xf32, #tpu.memory_space<vmem>>, vector<1x8xf32>
      %18 = arith.index_cast %13 : i32 to index
      %19 = memref.load %arg2[%18] : memref<8xi32, #tpu.memory_space<smem>>
      %20 = arith.index_cast %19 : i32 to index
      %c0_10 = arith.constant 0 : index
      %21 = vector.load %arg5[%20, %c0_10] : memref<48x8xf32, #tpu.memory_space<vmem>>, vector<1x8xf32>
      %22 = arith.mulf %17, %21 : vector<1x8xf32>
      %cst_11 = arith.constant dense<0.000000e+00> : vector<1xf32>
      %23 = vector.multi_reduction <add>, %22, %cst_11 [1] : vector<1x8xf32> to vector<1xf32>
      %24 = vector.shape_cast %23 : vector<1xf32> to vector<1x1xf32>
      %25 = arith.index_cast %13 : i32 to index
      %26 = memref.load %arg3[%25] : memref<8xf32, #tpu.memory_space<smem>>
      %27 = vector.broadcast %26 : f32 to vector<1x1xf32>
      %28 = arith.subf %24, %27 : vector<1x1xf32>
      %c8_i32_12 = arith.constant 8 : i32
      %29 = arith.cmpi slt, %13, %c8_i32_12 : i32
      %cst_13 = arith.constant 1.000000e+00 : f32
      %cst_14 = arith.constant 0.000000e+00 : f32
      %30 = arith.select %29, %cst_13, %cst_14 : f32
      %31 = arith.mulf %28, %28 : vector<1x1xf32>
      %32 = vector.broadcast %30 : f32 to vector<1x1xf32>
      %33 = arith.mulf %32, %31 : vector<1x1xf32>
      %34 = arith.addf %arg9, %33 : vector<1x1xf32>
      scf.yield %34 : vector<1x1xf32>
    }
    %c8_i32_3 = arith.constant 8 : i32
    %c0 = arith.constant 0 : index
    %c0_4 = arith.constant 0 : index
    %7 = vector.load %arg6[%c0, %c0_4] : memref<1x1xf32, #tpu.memory_space<vmem>>, vector<1x1xf32>
    %8 = arith.addf %7, %6 : vector<1x1xf32>
    %c0_5 = arith.constant 0 : index
    %c0_6 = arith.constant 0 : index
    %9 = vector.load %arg6[%c0_5, %c0_6] : memref<1x1xf32, #tpu.memory_space<vmem>>, vector<1x1xf32>
    tpu.vector_store %arg6[%c0_5, %c0_6], %8 {strides = array<i32>} : memref<1x1xf32, #tpu.memory_space<vmem>>, vector<1x1xf32>,
    %c0_i32_7 = arith.constant 0 : i32
    %10 = arith.cmpi eq, %arg0, %c0_i32_7 : i32
    %11 = arith.extui %10 : i1 to i32
    %c0_i32_8 = arith.constant 0 : i32
    %12 = arith.cmpi ne, %11, %c0_i32_8 : i32
    scf.if %12 {
      %c0_9 = arith.constant 0 : index
      %c0_10 = arith.constant 0 : index
      %13 = vector.load %arg6[%c0_9, %c0_10] : memref<1x1xf32, #tpu.memory_space<vmem>>, vector<1x1xf32>
      %c0_11 = arith.constant 0 : index
      %c0_12 = arith.constant 0 : index
      %14 = vector.load %arg4[%c0_11, %c0_12] : memref<32x8xf32, #tpu.memory_space<vmem>>, vector<32x8xf32>
      %c0_13 = arith.constant 0 : index
      %c0_14 = arith.constant 0 : index
      %15 = vector.load %arg5[%c0_13, %c0_14] : memref<48x8xf32, #tpu.memory_space<vmem>>, vector<48x8xf32>
      %16 = arith.mulf %14, %14 : vector<32x8xf32>
      %17 = vector.shape_cast %16 : vector<32x8xf32> to vector<1x32x8xf32>
      %cst_15 = arith.constant dense<0.000000e+00> : vector<1xf32>
      %18 = vector.multi_reduction <add>, %17, %cst_15 [1, 2] : vector<1x32x8xf32> to vector<1xf32>
      %19 = vector.shape_cast %18 : vector<1xf32> to vector<1x1x1xf32>
      %20 = vector.extract %19[0, 0, 0] : f32 from vector<1x1x1xf32>
      %21 = vector.broadcast %20 : f32 to vector<1x1xf32>
      %22 = arith.mulf %15, %15 : vector<48x8xf32>
      %23 = vector.shape_cast %22 : vector<48x8xf32> to vector<1x48x8xf32>
      %cst_16 = arith.constant dense<0.000000e+00> : vector<1xf32>
      %24 = vector.multi_reduction <add>, %23, %cst_16 [1, 2] : vector<1x48x8xf32> to vector<1xf32>
      %25 = vector.shape_cast %24 : vector<1xf32> to vector<1x1x1xf32>
      %26 = vector.extract %25[0, 0, 0] : f32 from vector<1x1x1xf32>
      %27 = vector.broadcast %26 : f32 to vector<1x1xf32>
      %28 = arith.addf %21, %27 : vector<1x1xf32>
      %cst_17 = arith.constant 3.000000e-02 : f32
      %29 = vector.broadcast %cst_17 : f32 to vector<1x1xf32>
      %30 = arith.mulf %29, %28 : vector<1x1xf32>
      %31 = arith.addf %13, %30 : vector<1x1xf32>
      %c0_18 = arith.constant 0 : index
      %c0_19 = arith.constant 0 : index
      %32 = vector.load %arg6[%c0_18, %c0_19] : memref<1x1xf32, #tpu.memory_space<vmem>>, vector<1x1xf32>
      tpu.vector_store %arg6[%c0_18, %c0_19], %31 {strides = array<i32>} : memref<1x1xf32, #tpu.memory_space<vmem>>, vector<1x1xf32>,
      %cst_20 = arith.constant 1.250000e-01 : f32
      %33 = vector.broadcast %cst_20 : f32 to vector<1x1xf32>
      %34 = arith.mulf %13, %33 : vector<1x1xf32>
      %35 = math.sqrt %34 : vector<1x1xf32>
      %c0_21 = arith.constant 0 : index
      %c0_22 = arith.constant 0 : index
      %36 = vector.load %arg7[%c0_21, %c0_22] : memref<1x1xf32, #tpu.memory_space<vmem>>, vector<1x1xf32>
      tpu.vector_store %arg7[%c0_21, %c0_22], %35 {strides = array<i32>} : memref<1x1xf32, #tpu.memory_space<vmem>>, vector<1x1xf32>,
    } else {
    }
    return
  }
  func.func @transform_0(%arg0: i32) -> i32 {
    %c0_i32 = arith.constant 0 : i32
    %c0_i32_0 = arith.constant 0 : i32
    return %c0_i32 : i32
  }
  func.func @transform_1(%arg0: i32) -> i32 {
    %c0_i32 = arith.constant 0 : i32
    %c0_i32_0 = arith.constant 0 : i32
    return %c0_i32 : i32
  }
  func.func @transform_2(%arg0: i32) -> i32 {
    %c0_i32 = arith.constant 0 : i32
    %c0_i32_0 = arith.constant 0 : i32
    return %c0_i32 : i32
  }
  func.func @transform_3(%arg0: i32) -> (i32, i32) {
    %c0_i32 = arith.constant 0 : i32
    %c0_i32_0 = arith.constant 0 : i32
    %c0_i32_1 = arith.constant 0 : i32
    return %c0_i32, %c0_i32_0 : i32, i32
  }
  func.func @transform_4(%arg0: i32) -> (i32, i32) {
    %c0_i32 = arith.constant 0 : i32
    %c0_i32_0 = arith.constant 0 : i32
    %c0_i32_1 = arith.constant 0 : i32
    return %c0_i32, %c0_i32_0 : i32, i32
  }
  func.func @transform_5(%arg0: i32) -> (i32, i32) {
    %c0_i32 = arith.constant 0 : i32
    %c0_i32_0 = arith.constant 0 : i32
    %c0_i32_1 = arith.constant 0 : i32
    return %c0_i32, %c0_i32_0 : i32, i32
  }
  func.func @transform_6(%arg0: i32) -> (i32, i32) {
    %c0_i32 = arith.constant 0 : i32
    %c0_i32_0 = arith.constant 0 : i32
    %c0_i32_1 = arith.constant 0 : i32
    return %c0_i32, %c0_i32_0 : i32, i32
  }
}

</mosaic_0001>

<bundles_post_ra>
// kernel: tpu_custom_call.1
= control target key start
LH: loop header
LB: loop body
LE: loop exit
PB: predicated region body
PF: predicated region fallthrough
CT: control target
= control target key end

     0   :  { %12 = vsyncpa [#allocation4], 0  ;;  %s476_s0 = inlined_call_operand.vmem [shape: s32[8], index: 0, kind: input, shape index: {}]   ;;  %s477_s1 = inlined_call_operand.vmem [shape: s32[8], index: 1, kind: input, shape index: {}]   ;;  %s478_s2 = inlined_call_operand.vmem [shape: f32[8], index: 2, kind: input, shape index: {}]   ;;  %s479_s3 = inlined_call_operand.vmem [shape: f32[32,8], index: 3, kind: input, shape index: {}]   ;;  %s480_s4 = inlined_call_operand.vmem [shape: f32[48,8], index: 4, kind: input, shape index: {}]   ;;  %s481_s5 = inlined_call_operand.hbm [shape: f32[1,1], index: 5, kind: output, shape index: {0}]   ;;  %s482_s6 = inlined_call_operand.hbm [shape: f32[1,1], index: 6, kind: output, shape index: {1}]  }
   0x1   :  { %13 = vsyncpa [#allocation6], 0 }
   0x2   :  { %14 = vsyncpa [#allocation3], 0  ;;  %s32_s23 = sshll.u32 %s477_s1, 4  ;;  %s33_s23 = int_to_ptr.vmem [resolvable:$true] %s32_s23 }
   0x3   :  { %15 = vsyncpa [#allocation10], 0  ;;  %s22_s26 = sshll.u32 %s476_s0, 4  ;;  %s243_s27 = scalar_lea.vmem %s33_s23, 16  ;;  %s23_s26 = int_to_ptr.vmem [resolvable:$true] %s22_s26 }
   0x4   :  { %p244_p0 = scmp.ne.s32.totalorder %s33_s23, %s243_s27  ;;  %p248_p1 = scmp.lt.s32.totalorder %s33_s23, %s33_s23 }
   0x5   :  { %p249_p2 = scmp.lt.s32.totalorder %s243_s27, %s243_s27 }
   0x7   :  { %p250_p3 = por %p249_p2, %p248_p1 }
   0x9   :  { %p251_p4 = pnand %p250_p3, %p244_p0 }
   0xb   :  { %254 = shalt.err (!%p251_p4)
}
   0xc   :  { %s347_s28 = smov [#allocation5]   ;;  %s255_s29 = scalar_lea.vmem %s23_s26, 16 }
   0xd   :  { %35 = dma.vmem_to_smem %s33_s23, 16, %s347_s28, [#allocation6]  }
   0xe   :  { %p256_p5 = scmp.ne.s32.totalorder %s23_s26, %s255_s29  ;;  %p260_p6 = scmp.lt.s32.totalorder %s23_s26, %s23_s26 }
   0xf   :  { %p261_p7 = scmp.lt.s32.totalorder %s255_s29, %s255_s29 }
  0x11   :  { %p262_p8 = por %p261_p7, %p260_p6 }
  0x13   :  { %p263_p9 = pnand %p262_p8, %p256_p5 }
  0x15   :  { %266 = shalt.err (!%p263_p9)
}
  0x16   :  { %s348_s1 = smov [#allocation2]   ;;  %s42_s7 = sshll.u32 %s478_s2, 4  ;;  %s43_s7 = int_to_ptr.vmem [resolvable:$true] %s42_s7 }
  0x17   :  { %25 = dma.vmem_to_smem %s23_s26, 16, %s348_s1, [#allocation4]  }
  0x18   :  { %s267_s8 = scalar_lea.vmem %s43_s7, 16  ;;  %p272_p11 = scmp.lt.s32.totalorder %s43_s7, %s43_s7 }
  0x19   :  { %p268_p10 = scmp.ne.s32.totalorder %s43_s7, %s267_s8  ;;  %p273_p12 = scmp.lt.s32.totalorder %s267_s8, %s267_s8 }
  0x1b   :  { %p274_p13 = por %p273_p12, %p272_p11 }
  0x1d   :  { %p275_p0 = pnand %p274_p13, %p268_p10 }
  0x1f   :  { %278 = shalt.err (!%p275_p0)
}
  0x20   :  { %s349_s9 = smov [#allocation7]  }
  0x21   :  { %45 = dma.vmem_to_smem %s43_s7, 16, %s349_s9, [#allocation6]  }
  0x22   :  { %331 = dma.done.wait [#allocation4], 16  }
  0x23   :  { %332 = vsyncadd [#allocation4], 4294967280 }
  0x24   :  { %333 = dma.done.wait [#allocation6], 32  }
  0x25   :  { %334 = vsyncadd [#allocation6], 4294967264 }
  0x26   :  { %59 = sfence }
  0x27   :  { %vm65_vm0 = vcmask 0   ;;  %v350_v0 = vmov 0.0   ;;  %v339_v1 = vmov 0.0   ;;  %s398_s2 = smov 0  }
  0x28   :  { %66 = vst.msk [vmem:[#allocation8] sm:$0x1] %vm65_vm0, %v350_v0 }
  0x29 LB: > { %s75_s10 = sld [smem:[#allocation2 + %s345_s2]]  ;;  %vm82_vm1 = vcmask 57344   ;;  %p89_p1 = scmp.lt.s32.totalorder %s345_s2, 8  ;;  %s345_s2 = sphi %s398_s2, %s72_s2   ;;  %v341_v1 = vphi %v339_v1, %v340_v1  }
  0x2a   : > { %s78_s11 = sld [smem:[#allocation5 + %s345_s2]] }
  0x2b   : > { %s86_s18 = sld [smem:[#allocation7 + %s345_s2]]  ;;  %s72_s2 = sadd.s32 1, %s345_s2  }
  0x2c   : > { %s90_s19 = scalar_select %p89_p1, 1.0, 0.0 }
  0x2d   : > { %p69_p2 = scmp.ge.s32.totalorder %s72_s2, 8  }
  0x2e   : > { %v92_v9 = vstv %s90_s19  ;;  %v103_v13 = vld [vmem:[%s479_s3] sm:$0xff] (%p69_p2)  ;;  %v104_v14 = vld [vmem:[%s479_s3 + $0x8] sm:$0xff] (%p69_p2)  ;;  %v105_v15 = vld [vmem:[%s479_s3 + $0x10] sm:$0xff] (%p69_p2)  ;;  %vm117_vm2 = vcmask (%p69_p2), 64512  }
  0x2f   : > { %s76_s14 = scalar_lea.vmem %s479_s3, %s75_s10  ;;  %v106_v16 = vld [vmem:[%s479_s3 + $0x18] sm:$0xff] (%p69_p2)  ;;  %v113_v17 = vmul.f32 (%p69_p2), %v103_v13, %v103_v13  ;;  %v114_v18 = vmul.f32 (%p69_p2), %v104_v14, %v104_v14  ;;  %v115_v19 = vmul.f32 (%p69_p2), %v105_v15, %v105_v15  ;;  %v107_v20 = vld [vmem:[%s480_s4] sm:$0xff] (%p69_p2)  ;;  %v108_v21 = vld [vmem:[%s480_s4 + $0x8] sm:$0xff] (%p69_p2) }
  0x30   : > { %s79_s17 = scalar_lea.vmem %s480_s4, %s78_s11  ;;  %v77_v2 = vld [vmem:[%s76_s14] sm:$0x1]  ;;  %v116_v22 = vmul.f32 (%p69_p2), %v106_v16, %v106_v16  ;;  %v109_v23 = vld [vmem:[%s480_s4 + $0x10] sm:$0xff] (%p69_p2)  ;;  %v110_v24 = vld [vmem:[%s480_s4 + $0x18] sm:$0xff] (%p69_p2)  ;;  %v135_v26 = vmul.f32 (%p69_p2), %v107_v20, %v107_v20  ;;  %v136_v27 = vmul.f32 (%p69_p2), %v108_v21, %v108_v21 }
  0x31   : > { %v80_v3 = vld [vmem:[%s79_s17] sm:$0x1]  ;;  %v87_v6 = vstv %s86_s18  ;;  %v118_v28 = vsel (%p69_p2), %vm117_vm2, %v113_v17, 0.0  ;;  %v119_v29 = vsel (%p69_p2), %vm117_vm2, %v114_v18, 0.0  ;;  %v121_v30 = vsel (%p69_p2), %vm117_vm2, %v115_v19, 0.0  ;;  %v112_v34 = vld [vmem:[%s480_s4 + $0x28] sm:$0xff] (%p69_p2) }
  0x32   : > { %v81_v4 = vmul.f32 %v80_v3, %v77_v2  ;;  %v111_v25 = vld [vmem:[%s480_s4 + $0x20] sm:$0xff] (%p69_p2)  ;;  %v137_v31 = vmul.f32 (%p69_p2), %v109_v23, %v109_v23  ;;  %v120_v32 = vadd.f32 (%p69_p2), %v119_v29, %v118_v28  ;;  %v123_v33 = vsel (%p69_p2), %vm117_vm2, %v116_v22, 0.0  ;;  %s351_s4 = smov (%p69_p2), [#allocation9]  }
  0x33   :  { %v138_v35 = vmul.f32 (%p69_p2), %v110_v24, %v110_v24  ;;  %v139_v36 = vmul.f32 (%p69_p2), %v111_v25, %v111_v25  ;;  %v141_v37 = vsel (%p69_p2), %vm117_vm2, %v135_v26, 0.0  ;;  %v142_v38 = vsel (%p69_p2), %vm117_vm2, %v136_v27, 0.0  ;;  %v95_v51 = vld [vmem:[#allocation8] sm:$0x1] (%p69_p2)  ;;  %s191_s12 = sshll.u32 (%p69_p2), %s351_s4, 4  ;;  %s192_s12 = int_to_ptr.vmem [resolvable:$true] %s191_s12 }
  0x34   : > { %v83_v5 = vsel %vm82_vm1, %v81_v4, 0.0  ;;  %v144_v39 = vsel (%p69_p2), %vm117_vm2, %v137_v31, 0.0  ;;  %v122_v40 = vadd.f32 (%p69_p2), %v121_v30, %v120_v32  ;;  %v143_v41 = vadd.f32 (%p69_p2), %v142_v38, %v141_v37  ;;  %s279_s13 = scalar_lea.vmem (%p69_p2), %s192_s12, 16  ;;  %s283_s14 = scalar_lea.vmem (%p69_p2), %s192_s12, 32 }
  0x35   : > { %84 = vadd.xlane.f32.xlu0 %v83_v5  ;;  %v140_v42 = vmul.f32 (%p69_p2), %v112_v34, %v112_v34  ;;  %v146_v43 = vsel (%p69_p2), %vm117_vm2, %v138_v35, 0.0  ;;  %v148_v46 = vsel (%p69_p2), %vm117_vm2, %v139_v36, 0.0  ;;  %p280_p3 = scmp.ne.s32.totalorder (%p69_p2), %s192_s12, %s279_s13  ;;  %p284_p4 = scmp.lt.s32.totalorder (%p69_p2), %s192_s12, %s192_s12 }
  0x36   :  { %v124_v44 = vadd.f32 (%p69_p2), %v123_v33, %v122_v40  ;;  %v145_v45 = vadd.f32 (%p69_p2), %v144_v39, %v143_v41  ;;  %p285_p5 = scmp.lt.s32.totalorder (%p69_p2), %s283_s14, %s279_s13 }
  0x37   :  { %v150_v48 = vsel (%p69_p2), %vm117_vm2, %v140_v42, 0.0 }
  0x38   :  { %v147_v47 = vadd.f32 (%p69_p2), %v146_v43, %v145_v45  ;;  %p286_p6 = por (%p69_p2), %p285_p5, %p284_p4 }
  0x39   :  { %125 = vadd.xlane.f32.xlu0 (%p69_p2), %v124_v44 }
  0x3a   :  { %v149_v49 = vadd.f32 (%p69_p2), %v148_v46, %v147_v47  ;;  %p287_p7 = pnand (%p69_p2), %p286_p6, %p280_p3 }
  0x3c   :  { %v151_v50 = vadd.f32 (%p69_p2), %v150_v48, %v149_v49 }
  0x3e   :  { %152 = vadd.xlane.f32.xlu0 (%p69_p2), %v151_v50 }
  0xc2   : > { %v85_v7 = vpop.xlane.xlu0 %84 }
  0xc3   : > { %v88_v8 = vsub.f32 %v85_v7, %v87_v6 }
  0xc5   : > { %v91_v10 = vmul.f32 %v88_v8, %v88_v8  ;;  %71 = sbr.rel (!%p69_p2) target bundleno = 41 (0x29), region = 77 }
  0xc7   : > { %v93_v11 = vmul.f32 %v92_v9, %v91_v10 }
  0xc9   : > { %v94_v12 = vadd.f32 %v341_v1, %v93_v11  }
  0xcb   : > { %v340_v1 = vmov %v94_v12   ;;  %v96_v52 = vadd.f32 (%p69_p2), %v95_v51, %v94_v12 }
  0xcd   :  { %98 = vst.msk [vmem:[#allocation8] sm:$0x1] %vm65_vm0, %v96_v52 }
  0xd4   :  { %v102_v53 = vld [vmem:[#allocation8] sm:$0x1] }
  0xd5   :  { %v166_v54 = vmul.f32 0.125, %v102_v53 }
  0xd7   :  { %241 = vrsqrt.f32 %v166_v54  ;;  %vm169_vm3 = vcmp.eq.f32.partialorder %v166_v54, inf  ;;  %v172_v57 = vand.u32 2147483648, %v166_v54  ;;  %vm171_vm4 = vcmp.eq.f32.partialorder %v166_v54, 0.0 }
  0xe1   :  { %v242_v55 = vpop.eup %241 }
  0xe2   :  { %v168_v56 = vmul.f32 %v242_v55, %v166_v54 }
  0xe4   :  { %v170_v58 = vsel %vm169_vm3, %v166_v54, %v168_v56 }
  0xe5   :  { %v173_v59 = vsel %vm171_vm4, %v172_v57, %v170_v58 }
  0xe6   :  { %174 = vst.msk [vmem:[#allocation9] sm:$0x1] %vm65_vm0, %v173_v59 }
  0xe7   :  { %290 = shalt.err (!%p287_p7)
}
  0xe8   :  { %s291_s17 = scalar_lea.hbm %s482_s6, 16 }
  0xe9   :  { %p292_p8 = scmp.ne.s32.totalorder %s482_s6, %s291_s17  ;;  %p295_p9 = scmp.lt.u32.totalorder %s291_s17, %s482_s6 }
  0xeb   :  { %p297_p10 = pnand %p295_p9, %p292_p8 }
  0xed   :  { %300 = shalt.err (!%p297_p10)
}
  0xee   :  { %194 = dma.vmem_to_hbm [thread:$0]  %s192_s12, 16, %s482_s6, [#allocation10]   ;;  %v126_v60 = vpop.xlane.xlu0 %125 }
  0xef   :  { %v127_v61 = vrot.slane %v126_v60, 4  ;;  %s352_s6 = smov [#allocation8]  }
  0xf0   :  { %s181_s26 = sshll.u32 %s352_s6, 4  ;;  %s182_s26 = int_to_ptr.vmem [resolvable:$true] %s181_s26 }
  0xf1   :  { %v128_v62 = vadd.f32 %v127_v61, %v126_v60  ;;  %s301_s27 = scalar_lea.vmem %s182_s26, 16  ;;  %s305_s28 = scalar_lea.vmem %s182_s26, 32 }
  0xf2   :  { %v153_v0 = vpop.xlane.xlu0 %152  ;;  %p302_p11 = scmp.ne.s32.totalorder %s182_s26, %s301_s27  ;;  %p306_p12 = scmp.lt.s32.totalorder %s182_s26, %s182_s26 }
  0xf3   :  { %v129_v63 = vrot.slane %v128_v62, 2  ;;  %v154_v1 = vrot.slane %v153_v0, 4  ;;  %p307_p13 = scmp.lt.s32.totalorder %s305_s28, %s301_s27 }
  0xf5   :  { %v130_v2 = vadd.f32 %v129_v63, %v128_v62  ;;  %v155_v3 = vadd.f32 %v154_v1, %v153_v0  ;;  %p308_p0 = por %p307_p13, %p306_p12 }
  0xf7   :  { %v131_v4 = vrot.slane %v130_v2, 1  ;;  %v156_v5 = vrot.slane %v155_v3, 2  ;;  %p309_p1 = pnand %p308_p0, %p302_p11 }
  0xf9   :  { %v132_v6 = vadd.f32 %v131_v4, %v130_v2  ;;  %v157_v7 = vadd.f32 %v156_v5, %v155_v3 }
  0xfb   :  { %215 = vpush %v132_v6  ;;  %v158_v8 = vrot.slane %v157_v7, 1 }
  0xfd   :  { %v159_v9 = vadd.f32 %v158_v8, %v157_v7 }
  0xff   :  { %217 = vpush %v159_v9 }
 0x12c   :  { %s216_s24 = spop %215 }
 0x12d   :  { %v134_v10 = vstv %s216_s24 }
 0x130   :  { %s218_s25 = spop %217 }
 0x131   :  { %v161_v11 = vstv %s218_s25 }
 0x132   :  { %v162_v12 = vadd.f32 %v161_v11, %v134_v10 }
 0x134   :  { %v163_v13 = vmul.f32 0.03, %v162_v12 }
 0x136   :  { %v164_v14 = vadd.f32 %v163_v13, %v102_v53 }
 0x138   :  { %165 = vst.msk [vmem:[#allocation8] sm:$0x1] %vm65_vm0, %v164_v14 }
 0x139   :  { %312 = shalt.err (!%p309_p1)
}
 0x13a   :  { %s313_s0 = scalar_lea.hbm %s481_s5, 16 }
 0x13b   :  { %p314_p2 = scmp.ne.s32.totalorder %s481_s5, %s313_s0  ;;  %p317_p3 = scmp.lt.u32.totalorder %s313_s0, %s481_s5 }
 0x13d   :  { %p319_p4 = pnand %p317_p3, %p314_p2 }
 0x13f   :  { %322 = shalt.err (!%p319_p4)
}
 0x140   :  { %184 = dma.vmem_to_hbm [thread:$0]  %s182_s26, 16, %s481_s5, [#allocation3]  }
 0x141   :  { %335 = dma.done.wait [#allocation3], 16  }
 0x142   :  { %336 = vsyncadd [#allocation3], 4294967280 }
 0x143   :  { %337 = dma.done.wait [#allocation10], 16  }
 0x144   :  { %338 = vsyncadd [#allocation10], 4294967280 }
 0x145   :  { %201 = vsyncpa [#allocation3], 1 }
 0x146   :  { %202 = vsyncpa [#allocation10], 1 }
 0x147   :  { %203 = vsyncpa [#allocation4], 1 }
 0x148   :  { %204 = vsyncpa [#allocation6], 1 }

</bundles_post_ra>
